<compile_context>
chip_gen: v7x
topology: tpu7x:2x2x1
jax: 0.10.0
libtpu: 0.0.40
codegen_flags: <defaults>
</compile_context>

<pallas_src>
import math

import jax
import jax.numpy as jnp
from jax.experimental import pallas as pl
from jax.experimental.pallas import tpu as pltpu


def _lora_linear_kernel(x_ref, wt_ref, xa_ref, b_ref, o_ref, acc_ref):
    """One (tm, tn) output tile; base matmul accumulated over the K grid axis."""
    k = pl.program_id(2)

    @pl.when(k == 0)
    def _():
        acc_ref[...] = jnp.zeros_like(acc_ref)

    # Base projection: bf16 x bf16 -> f32 MXU accumulate across K tiles.
    acc_ref[...] += jnp.dot(x_ref[...], wt_ref[...],
                            preferred_element_type=jnp.float32)

    @pl.when(k == pl.num_programs(2) - 1)
    def _():
        # LoRA up-projection only once per (i, j) tile.  xa = x @ A was
        # precomputed outside the kernel; `scale` is already folded into B.
        lora = jnp.dot(xa_ref[...], b_ref[...],
                       preferred_element_type=jnp.float32)
        o_ref[...] = (acc_ref[...] + lora).astype(o_ref.dtype)


def _round_up(x, m):
    return -(-x // m) * m


def _sublane_pack(dtype):
    """Rows per sublane tile: 8 for f32, 16 for bf16, 32 for int8/fp8."""
    it = jnp.dtype(dtype).itemsize
    return {1: 32, 2: 16, 4: 8}.get(it, 8)


def _vmem_block_bytes(rows, cols, dtype):
    """VMEM footprint of one (rows, cols) block, incl. lane/sublane padding."""
    it = jnp.dtype(dtype).itemsize
    return _round_up(rows, _sublane_pack(dtype)) * _round_up(cols, 128) * it


def _pick_tile(dim, target, align):
    """Largest `align`-multiple <= target that divides `dim`.  If dim is small,
    use the full dim.  If no aligned divisor exists, return the aligned target;
    the caller zero-pads the dim up to a tile multiple (exact for a matmul)."""
    if dim <= target:
        return dim
    t = (target // align) * align
    while t >= align:
        if dim % t == 0:
            return t
        t -= align
    return (target // align) * align


def prepare_lora_linear_params(weight, lora_A, lora_B, *, scale=2.0,
                               rank_align=None):
    """One-time (load-time) parameter prep — NOT per forward call.

    * Transposes the frozen PyTorch-layout weight (N, K) -> (K, N) so the base
      matmul is a plain row-major MXU dot (no per-call HBM transpose).
    * Zero-pads the LoRA rank to a dtype-aware sublane pack (16 for bf16);
      exact, since padded rows/cols contribute 0.
    * Folds `scale` into lora_B so the kernel's up-projection is a plain
      bf16 x bf16 dot (no per-tile scale / upcast).
    """
    weight_t = jnp.asarray(weight).T          # (in_features, out_features)
    lora_A = jnp.asarray(lora_A)
    lora_B = jnp.asarray(lora_B)
    if rank_align is None:
        rank_align = _sublane_pack(lora_A.dtype)
    r = lora_A.shape[1]
    r_pad = _round_up(r, rank_align)
    if r_pad != r:
        lora_A = jnp.pad(lora_A, ((0, 0), (0, r_pad - r)))
        lora_B = jnp.pad(lora_B, ((0, r_pad - r), (0, 0)))
    lora_B = (lora_B.astype(jnp.float32) * float(scale)).astype(lora_B.dtype)
    return weight_t, lora_A, lora_B


def merge_lora_into_weight_t(weight_t, lora_A, lora_B_scaled):
    """Optional pure-inference path (fixed adapter): fold the adapter into the
    base weight once; the forward then degenerates to a single GEMM."""
    return (weight_t.astype(jnp.float32)
            + jnp.dot(lora_A.astype(jnp.float32),
                      lora_B_scaled.astype(jnp.float32))).astype(weight_t.dtype)


def linear_lora_forward(x, weight_t, lora_A, lora_B, *,
                        tm_target=256, tn_target=512, tk_target=1024):
    """x: (..., K); weight_t: (K, N) pre-transposed; lora_A: (K, r_pad);
    lora_B: (r_pad, N) with `scale` already folded in
    (see prepare_lora_linear_params)."""
    orig_shape = x.shape
    K = orig_shape[-1]
    M = int(x.size // K)
    x2d = x.reshape(M, K)

    N = weight_t.shape[1]
    r = lora_A.shape[1]          # already sublane-padded at prep time

    # LoRA down-projection: one tiny (M, r) matmul, computed ONCE per forward
    # (not once per N tile).  f32 accumulate, then back to x.dtype — the rank-r
    # contraction inputs were bf16 anyway, so this is numerically inconsequential.
    xa = jnp.dot(x2d, lora_A, preferred_element_type=jnp.float32).astype(x.dtype)

    # Tile sizes: lane dims 128-aligned (MXU-optimal on v5e too); x's sublane
    # dim aligned to its packing (16 rows for bf16).
    tm = _pick_tile(M, tm_target, _sublane_pack(x.dtype))
    tn = _pick_tile(N, tn_target, 128)
    tk = _pick_tile(K, tk_target, 128)

    # Zero-pad awkward dims up to a tile multiple (exact) — keeps every block's
    # VMEM footprint bounded instead of falling back to a full-extent slab.
    M_pad, N_pad, K_pad = _round_up(M, tm), _round_up(N, tn), _round_up(K, tk)
    if (M_pad, K_pad) != (M, K):
        x2d = jnp.pad(x2d, ((0, M_pad - M), (0, K_pad - K)))
    if M_pad != M:
        xa = jnp.pad(xa, ((0, M_pad - M), (0, 0)))
    if (K_pad, N_pad) != (K, N):
        weight_t = jnp.pad(weight_t, ((0, K_pad - K), (0, N_pad - N)))
    if N_pad != N:
        lora_B = jnp.pad(lora_B, ((0, 0), (0, N_pad - N)))

    grid = (M_pad // tm, N_pad // tn, K_pad // tk)

    # Weight stream: deepen buffering for decode-shaped (single M tile,
    # weight-streaming-bound) problems with enough grid steps to benefit.
    deep_w = grid[0] == 1 and grid[1] * grid[2] >= 4
    w_spec = (pl.BlockSpec((tk, tn), lambda i, j, k: (k, j),
                           pipeline_mode=pl.Buffered(3))
              if deep_w else
              pl.BlockSpec((tk, tn), lambda i, j, k: (k, j)))

    # VMEM budget from actual (lane/sublane-padded) block footprints, with
    # headroom; capped under per-device physical VMEM (64 MiB/TC on v7x,
    # 128 MiB on v5e/v6e).
    needed = (2 * _vmem_block_bytes(tm, tk, x2d.dtype)
              + (3 if deep_w else 2) * _vmem_block_bytes(tk, tn, weight_t.dtype)
              + 2 * _vmem_block_bytes(tm, r, xa.dtype)
              + 2 * _vmem_block_bytes(r, tn, lora_B.dtype)
              + 2 * _vmem_block_bytes(tm, tn, x.dtype)
              + _vmem_block_bytes(tm, tn, jnp.float32))
    try:
        phys_vmem = int(pltpu.get_tpu_info().vmem_capacity_bytes)
    except Exception:
        phys_vmem = 64 << 20   # conservative: v7x per-TensorCore VMEM
    cap = max(phys_vmem - (12 << 20), 32 << 20)
    vmem_limit = int(min(max(needed + (8 << 20), 16 << 20), cap))

    flops = 2 * M_pad * N_pad * K_pad + 2 * M_pad * r * N_pad
    bytes_accessed = (x2d.size * x2d.dtype.itemsize
                      + weight_t.size * weight_t.dtype.itemsize
                      + xa.size * xa.dtype.itemsize
                      + lora_B.size * lora_B.dtype.itemsize
                      + M_pad * N_pad * jnp.dtype(x.dtype).itemsize)

    out2d = pl.pallas_call(
        _lora_linear_kernel,
        out_shape=jax.ShapeDtypeStruct((M_pad, N_pad), x.dtype),
        grid_spec=pltpu.PrefetchScalarGridSpec(
            num_scalar_prefetch=0,
            grid=grid,
            in_specs=[
                pl.BlockSpec((tm, tk), lambda i, j, k: (i, k)),   # x
                w_spec,                                           # W^T
                pl.BlockSpec((tm, r), lambda i, j, k: (i, 0)),    # xa = x @ A
                pl.BlockSpec((r, tn), lambda i, j, k: (0, j)),    # scale*lora_B
            ],
            out_specs=pl.BlockSpec((tm, tn), lambda i, j, k: (i, j)),
            scratch_shapes=[
                pltpu.VMEM((tm, tn), jnp.float32),  # f32 accumulator
            ],
        ),
        compiler_params=pltpu.CompilerParams(
            dimension_semantics=("parallel", "parallel", "arbitrary"),
            vmem_limit_bytes=vmem_limit,
        ),
        cost_estimate=pl.CostEstimate(flops=flops, transcendentals=0,
                                      bytes_accessed=bytes_accessed),
    )(x2d, weight_t, xa, lora_B)

    if (M_pad, N_pad) != (M, N):
        out2d = out2d[:M, :N]
    return out2d.reshape(*orig_shape[:-1], N)


if __name__ == "__main__":
    # Small shapes consistent with the module: batch=2, seq=8, hidden=32, r=4.
    batch, seq = 2, 8
    in_features, out_features, r = 32, 32, 4
    dtype = jnp.bfloat16

    key = jax.random.PRNGKey(0)
    kx, kw, ka, kb = jax.random.split(key, 4)

    x = jax.random.normal(kx, (batch, seq, in_features),
                          dtype=jnp.float32).astype(dtype)
    # Frozen base weight, PyTorch layout (out_features, in_features).
    weight = (jax.random.normal(kw, (out_features, in_features),
                                dtype=jnp.float32) * 0.05).astype(dtype)

    # lora_A: kaiming_uniform_(a=sqrt(5)) on (in_features, r): bound = 1/sqrt(r)
    bound = 1.0 / math.sqrt(r)
    lora_A = jax.random.uniform(ka, (in_features, r), minval=-bound,
                                maxval=bound, dtype=jnp.float32).astype(dtype)
    # The module initializes lora_B to zeros; use a small non-zero adapter
    # (as after training) so the LoRA path is actually exercised numerically.
    lora_B = (jax.random.normal(kb, (r, out_features), dtype=jnp.float32)
              * 0.1).astype(dtype)

    scale = 2.0

    # One-time parameter prep (weight transpose, rank padding, scale folding) —
    # outside the per-call forward path.
    weight_t, lora_A_p, lora_B_p = prepare_lora_linear_params(
        weight, lora_A, lora_B, scale=scale)

    out = jax.block_until_ready(
        linear_lora_forward(x, weight_t, lora_A_p, lora_B_p))

    # Pure-JAX f32 reference with the original (unpadded, unscaled) params.
    xf = x.astype(jnp.float32)
    ref = (xf @ weight.T.astype(jnp.float32)
           + scale * ((xf @ lora_A.astype(jnp.float32))
                      @ lora_B.astype(jnp.float32)))
    assert out.shape == (batch, seq, out_features)
    assert out.dtype == dtype
    assert jnp.allclose(out.astype(jnp.float32), ref, atol=3e-2, rtol=3e-2)

    print("KERNEL_OK")
</pallas_src>

<mosaic_0001>
module attributes {stable_mosaic.version = 11 : i64} {
  func.func @_lora_linear_kernel(%arg0: i32, %arg1: i32, %arg2: i32, %arg3: memref<16x32xbf16, #tpu.memory_space<vmem>>, %arg4: memref<32x32xbf16, #tpu.memory_space<vmem>>, %arg5: memref<16x16xbf16, #tpu.memory_space<vmem>>, %arg6: memref<16x32xbf16, #tpu.memory_space<vmem>>, %arg7: memref<16x32xbf16, #tpu.memory_space<vmem>>, %arg8: memref<16x32xf32, #tpu.memory_space<vmem>>) attributes {dimension_semantics = [#tpu.dimension_semantics<parallel>, #tpu.dimension_semantics<parallel>, #tpu.dimension_semantics<arbitrary>], iteration_bounds = array<i64: 1, 1, 1>, scalar_prefetch = 0 : i64, scratch_operands = 1 : i64, tpu.core_type = #tpu.core_type<tc>, window_params = [{transform_indices = @transform_0, window_bounds = array<i64: 16, 32>}, {transform_indices = @transform_1, window_bounds = array<i64: 32, 32>}, {transform_indices = @transform_2, window_bounds = array<i64: 16, 16>}, {transform_indices = @transform_3, window_bounds = array<i64: 16, 32>}, {transform_indices = @transform_4, window_bounds = array<i64: 16, 32>}]} {
    %c0_i32 = arith.constant 0 : i32
    %0 = arith.cmpi eq, %arg2, %c0_i32 : i32
    %1 = arith.extui %0 : i1 to i32
    %c0_i32_0 = arith.constant 0 : i32
    %2 = arith.cmpi ne, %1, %c0_i32_0 : i32
    scf.if %2 {
      %cst_10 = arith.constant 0.000000e+00 : f32
      %12 = vector.broadcast %cst_10 : f32 to vector<16x32xf32>
      %c0_11 = arith.constant 0 : index
      %c0_12 = arith.constant 0 : index
      %13 = vector.load %arg8[%c0_11, %c0_12] : memref<16x32xf32, #tpu.memory_space<vmem>>, vector<16x32xf32>
      tpu.vector_store %arg8[%c0_11, %c0_12], %12 {strides = array<i32>} : memref<16x32xf32, #tpu.memory_space<vmem>>, vector<16x32xf32>,
    } else {
    }
    %c0 = arith.constant 0 : index
    %c0_1 = arith.constant 0 : index
    %3 = vector.load %arg8[%c0, %c0_1] : memref<16x32xf32, #tpu.memory_space<vmem>>, vector<16x32xf32>
    %c0_2 = arith.constant 0 : index
    %c0_3 = arith.constant 0 : index
    %4 = vector.load %arg3[%c0_2, %c0_3] : memref<16x32xbf16, #tpu.memory_space<vmem>>, vector<16x32xbf16>
    %c0_4 = arith.constant 0 : index
    %c0_5 = arith.constant 0 : index
    %5 = vector.load %arg4[%c0_4, %c0_5] : memref<32x32xbf16, #tpu.memory_space<vmem>>, vector<32x32xbf16>
    %cst = arith.constant dense<0.000000e+00> : vector<16x32xf32>
    %6 = tpu.matmul %4, %5, %cst {dimension_numbers = #tpu.dot_dimension_numbers<[1], [0], [0], [1], [0, 0, 1, 1], [], []>} : vector<16x32xbf16>, vector<32x32xbf16>, vector<16x32xf32> -> vector<16x32xf32>
    %7 = arith.addf %3, %6 : vector<16x32xf32>
    %c0_6 = arith.constant 0 : index
    %c0_7 = arith.constant 0 : index
    %8 = vector.load %arg8[%c0_6, %c0_7] : memref<16x32xf32, #tpu.memory_space<vmem>>, vector<16x32xf32>
    tpu.vector_store %arg8[%c0_6, %c0_7], %7 {strides = array<i32>} : memref<16x32xf32, #tpu.memory_space<vmem>>, vector<16x32xf32>,
    %c0_i32_8 = arith.constant 0 : i32
    %9 = arith.cmpi eq, %arg2, %c0_i32_8 : i32
    %10 = arith.extui %9 : i1 to i32
    %c0_i32_9 = arith.constant 0 : i32
    %11 = arith.cmpi ne, %10, %c0_i32_9 : i32
    scf.if %11 {
      %c0_10 = arith.constant 0 : index
      %c0_11 = arith.constant 0 : index
      %12 = vector.load %arg5[%c0_10, %c0_11] : memref<16x16xbf16, #tpu.memory_space<vmem>>, vector<16x16xbf16>
      %c0_12 = arith.constant 0 : index
      %c0_13 = arith.constant 0 : index
      %13 = vector.load %arg6[%c0_12, %c0_13] : memref<16x32xbf16, #tpu.memory_space<vmem>>, vector<16x32xbf16>
      %cst_14 = arith.constant dense<0.000000e+00> : vector<16x32xf32>
      %14 = tpu.matmul %12, %13, %cst_14 {dimension_numbers = #tpu.dot_dimension_numbers<[1], [0], [0], [1], [0, 0, 1, 1], [], []>} : vector<16x16xbf16>, vector<16x32xbf16>, vector<16x32xf32> -> vector<16x32xf32>
      %c0_15 = arith.constant 0 : index
      %c0_16 = arith.constant 0 : index
      %15 = vector.load %arg8[%c0_15, %c0_16] : memref<16x32xf32, #tpu.memory_space<vmem>>, vector<16x32xf32>
      %16 = arith.addf %15, %14 : vector<16x32xf32>
      %17 = arith.truncf %16 : vector<16x32xf32> to vector<16x32xbf16>
      %c0_17 = arith.constant 0 : index
      %c0_18 = arith.constant 0 : index
      %18 = vector.load %arg7[%c0_17, %c0_18] : memref<16x32xbf16, #tpu.memory_space<vmem>>, vector<16x32xbf16>
      tpu.vector_store %arg7[%c0_17, %c0_18], %17 {strides = array<i32>} : memref<16x32xbf16, #tpu.memory_space<vmem>>, vector<16x32xbf16>,
    } else {
    }
    return
  }
  func.func @transform_0(%arg0: i32, %arg1: i32, %arg2: i32) -> (i32, i32) {
    %c0_i32 = arith.constant 0 : i32
    return %arg0, %arg2 : i32, i32
  }
  func.func @transform_1(%arg0: i32, %arg1: i32, %arg2: i32) -> (i32, i32) {
    %c0_i32 = arith.constant 0 : i32
    return %arg2, %arg1 : i32, i32
  }
  func.func @transform_2(%arg0: i32, %arg1: i32, %arg2: i32) -> (i32, i32) {
    %c0_i32 = arith.constant 0 : i32
    %c0_i32_0 = arith.constant 0 : i32
    return %arg0, %c0_i32 : i32, i32
  }
  func.func @transform_3(%arg0: i32, %arg1: i32, %arg2: i32) -> (i32, i32) {
    %c0_i32 = arith.constant 0 : i32
    %c0_i32_0 = arith.constant 0 : i32
    return %c0_i32, %arg1 : i32, i32
  }
  func.func @transform_4(%arg0: i32, %arg1: i32, %arg2: i32) -> (i32, i32) {
    %c0_i32 = arith.constant 0 : i32
    return %arg0, %arg1 : i32, i32
  }
}

</mosaic_0001>

<bundles_post_ra>
// kernel: tpu_custom_call.1
= control target key start
LH: loop header
LB: loop body
LE: loop exit
PB: predicated region body
PF: predicated region fallthrough
CT: control target
= control target key end

     0   :  { %9 = vsyncpa [#allocation4], 0  ;;  %s482_s0 = inlined_call_operand.hbm [shape: bf16[16,32], index: 0, kind: input, shape index: {}]   ;;  %s483_s1 = inlined_call_operand.hbm [shape: bf16[32,32], index: 1, kind: input, shape index: {}]   ;;  %s484_s2 = inlined_call_operand.hbm [shape: bf16[16,16], index: 2, kind: input, shape index: {}]   ;;  %s485_s3 = inlined_call_operand.vmem [shape: bf16[16,32], index: 3, kind: input, shape index: {}]   ;;  %s486_s4 = inlined_call_operand.hbm [shape: bf16[16,32], index: 4, kind: output, shape index: {}]  }
   0x1   :  { %10 = vsyncpa [#allocation7], 0 }
   0x2   :  { %11 = vsyncpa [#allocation5], 0  ;;  %s374_s15 = smov [#allocation6]   ;;  %s375_s17 = smov [#allocation3]  }
   0x3   :  { %s29_s16 = sshll.u32 %s374_s15, 4  ;;  %s17_s18 = sshll.u32 %s375_s17, 4  ;;  %s30_s16 = int_to_ptr.vmem [resolvable:$true] %s29_s16  ;;  %s407_s18 = int_to_ptr.vmem [resolvable:$true] %s17_s18 }
   0x4   :  { %s280_s21 = scalar_lea.hbm %s483_s1, 256 }
   0x5   :  { %p281_p0 = scmp.ne.s32.totalorder %s483_s1, %s280_s21  ;;  %p284_p1 = scmp.lt.u32.totalorder %s280_s21, %s483_s1 }
   0x7   :  { %p286_p2 = pnand %p284_p1, %p281_p0 }
   0x9   :  { %289 = shalt.err (!%p286_p2)
}
   0xa   :  { %s290_s26 = scalar_lea.vmem %s30_s16, 256  ;;  %p295_p4 = scmp.lt.s32.totalorder %s30_s16, %s30_s16 }
   0xb   :  { %p291_p3 = scmp.ne.s32.totalorder %s30_s16, %s290_s26  ;;  %p296_p5 = scmp.lt.s32.totalorder %s290_s26, %s290_s26 }
   0xd   :  { %p297_p6 = por %p296_p5, %p295_p4 }
   0xf   :  { %p298_p7 = pnand %p297_p6, %p291_p3 }
  0x11   :  { %301 = shalt.err (!%p298_p7)
}
  0x12   :  { %s376_s27 = smov 64   ;;  %s377_s28 = smov 4  }
  0x13   :  { %35 = dma.hbm_to_vmem [thread:$0]  %s483_s1, 256, %s30_s16, [#allocation7], %s376_s27, %s376_s27, %s377_s28  }
  0x14   :  { %s302_s7 = scalar_lea.hbm %s482_s0, 128 }
  0x15   :  { %p303_p8 = scmp.ne.s32.totalorder %s482_s0, %s302_s7  ;;  %p306_p9 = scmp.lt.u32.totalorder %s302_s7, %s482_s0 }
  0x17   :  { %p308_p10 = pnand %p306_p9, %p303_p8 }
  0x19   :  { %311 = shalt.err (!%p308_p10)
}
  0x1a   :  { %s312_s12 = scalar_lea.vmem %s407_s18, 128  ;;  %p317_p12 = scmp.lt.s32.totalorder %s407_s18, %s407_s18 }
  0x1b   :  { %p313_p11 = scmp.ne.s32.totalorder %s407_s18, %s312_s12  ;;  %p318_p13 = scmp.lt.s32.totalorder %s312_s12, %s312_s12 }
  0x1d   :  { %p319_p0 = por %p318_p13, %p317_p12 }
  0x1f   :  { %p320_p1 = pnand %p319_p0, %p313_p11 }
  0x21   :  { %323 = shalt.err (!%p320_p1)
}
  0x22   :  { %23 = dma.hbm_to_vmem [thread:$0]  %s482_s0, 128, %s407_s18, [#allocation4], %s376_s27, %s376_s27, %s377_s28  }
  0x23   :  { %s378_s14 = smov [#allocation8]   ;;  %s324_s19 = scalar_lea.hbm %s484_s2, 128 }
  0x24   :  { %s41_s15 = sshll.u32 %s378_s14, 4  ;;  %p325_p2 = scmp.ne.s32.totalorder %s484_s2, %s324_s19  ;;  %s42_s15 = int_to_ptr.vmem [resolvable:$true] %s41_s15 }
  0x25   :  { %p328_p3 = scmp.lt.u32.totalorder %s324_s19, %s484_s2 }
  0x27   :  { %p330_p4 = pnand %p328_p3, %p325_p2 }
  0x29   :  { %333 = shalt.err (!%p330_p4)
}
  0x2a   :  { %s334_s24 = scalar_lea.vmem %s42_s15, 128  ;;  %p339_p6 = scmp.lt.s32.totalorder %s42_s15, %s42_s15 }
  0x2b   :  { %p335_p5 = scmp.ne.s32.totalorder %s42_s15, %s334_s24  ;;  %p340_p7 = scmp.lt.s32.totalorder %s334_s24, %s334_s24 }
  0x2d   :  { %p341_p8 = por %p340_p7, %p339_p6 }
  0x2f   :  { %p342_p9 = pnand %p341_p8, %p335_p5 }
  0x31   :  { %345 = shalt.err (!%p342_p9)
}
  0x32   :  { %47 = dma.hbm_to_vmem [thread:$0]  %s484_s2, 128, %s42_s15, [#allocation7], %s376_s27, %s376_s27, %s377_s28  }
  0x33   :  { %368 = dma.done.wait [#allocation4], 128  }
  0x34   :  { %369 = vsyncadd [#allocation4], 4294967168 }
  0x35   :  { %370 = dma.done.wait [#allocation7], 384  }
  0x36   :  { %371 = vsyncadd [#allocation7], 4294966912  ;;  %vm64_vm0 = vcmask 261120   ;;  %v379_v0 = vmov 0.0   ;;  %vm380_vm1 = vmmov 0   ;;  %v275_v1 = vld [vmem:[#allocation6] sm:$0xff]  }
  0x37   :  { %253 = vmatprep.subr.bf16.mxu0 %v379_v0  ;;  %257 = vmatprep.mubr.msk.bf16.mxu0 %vm380_vm1, %v379_v0  ;;  %65 = vst.msk [vmem:[#allocation2] sm:$0xff] %vm64_vm0, %v379_v0  ;;  %66 = vst.msk [vmem:[#allocation2 + $0x8] sm:$0xff] %vm64_vm0, %v379_v0  ;;  %v276_v2 = vld [vmem:[#allocation6 + $0x8] sm:$0xff]   ;;  %v279_v4 = vld [vmem:[#allocation8] sm:$0xff]   ;;  %vm159_vm2 = vcmask 130048   ;;  %vm216_vm3 = vcmask 257024  }
  0x38   :  { %261 = vmatprep.subr.bf16.mxu1 %v379_v0  ;;  %263 = vmatprep.mubr.msk.bf16.mxu1 %vm380_vm1, %v379_v0  ;;  %v278_v3 = vld [vmem:[%s485_s3] sm:$0xff]   ;;  %v277_v5 = vld [vmem:[#allocation3] sm:$0xff]   ;;  %s381_s3 = smov [#allocation9]  }
  0x39   :  { %254 = vmatpush3.bf16.msra.mxu0 %v275_v1  ;;  %262 = vmatpush3.bf16.msra.mxu1 %v278_v3  ;;  %s224_s26 = sshll.u32 %s381_s3, 4  ;;  %s225_s26 = int_to_ptr.vmem [resolvable:$true] %s224_s26 }
  0x3a   :  { %255 = vmatprep.subr.bf16.mxu0 %v379_v0  ;;  %s346_s29 = scalar_lea.vmem %s225_s26, 128  ;;  %p351_p11 = scmp.lt.s32.totalorder %s225_s26, %s225_s26 }
  0x3b   :  { %p347_p10 = scmp.ne.s32.totalorder %s225_s26, %s346_s29  ;;  %p352_p12 = scmp.lt.s32.totalorder %s346_s29, %s346_s29 }
  0x3c   :  { %264 = vmatmul.mubr.msk.bf16.vlgmr.msra.gmra.mrb[0].mxu1 %vm159_vm2, %v279_v4 }
  0x3d   :  { %256 = vmatpush3.bf16.msra.mxu0 %v276_v2  ;;  %p353_p13 = por %p352_p12, %p351_p11 }
  0x3e   :  { %v67_v6 = vld [vmem:[#allocation2] sm:$0xff]  ;;  %v68_v9 = vld [vmem:[#allocation2 + $0x8] sm:$0xff] }
  0x3f   :  { %p354_p0 = pnand %p353_p13, %p347_p10 }
  0x40   :  { %258 = vmatmul.mubr.msk.bf16.vlgmr.msra.gmra.mrb[0].mxu0 %vm64_vm0, %v277_v5 }
 0x10f   :  { %v197_v7 = vpop.f32.mrb[0].mxu1 }
 0x110   :  { %v265_v10 = vpop.f32.mrb[1].mxu1 }
 0x111   :  { %v200_v13 = vpop.f32.mrb[2].mxu1 }
 0x112   :  { %v266_v15 = vpop.f32.mrb[3].mxu1 }
 0x113   :  { %v130_v8 = vpop.f32.mrb[0].mxu0 }
 0x114   :  { %v137_v11 = vadd.f32 %v130_v8, %v67_v6  ;;  %v259_v12 = vpop.f32.mrb[1].mxu0 }
 0x115   :  { %v133_v14 = vpop.f32.mrb[2].mxu0 }
 0x116   :  { %139 = vst.msk [vmem:[#allocation2] sm:$0xff] %vm64_vm0, %v137_v11  ;;  %v138_v16 = vadd.f32 %v133_v14, %v68_v9  ;;  %v260_v17 = vpop.f32.mrb[3].mxu0 }
 0x118   :  { %140 = vst.msk [vmem:[#allocation2 + $0x8] sm:$0xff] %vm64_vm0, %v138_v16 }
 0x11d   :  { %v204_v18 = vld [vmem:[#allocation2] sm:$0xff] }
 0x11e   :  { %v206_v19 = vadd.f32 %v204_v18, %v197_v7 }
 0x11f   :  { %v205_v20 = vld [vmem:[#allocation2 + $0x8] sm:$0xff] }
 0x120   :  { %v246_v21 = vpack.c.bf16 %v206_v19, %v206_v19  ;;  %v207_v22 = vadd.f32 %v205_v20, %v200_v13 }
 0x122   :  { %v247_v23 = vpack.c.bf16 %v207_v22, %v207_v22  ;;  %217 = vst.msk [vmem:[#allocation9] sm:$0xf] %vm216_vm3, %v246_v21 }
 0x124   :  { %218 = vst.msk [vmem:[#allocation9 + $0x4] sm:$0xf] %vm216_vm3, %v247_v23 }
 0x125   :  { %357 = shalt.err (!%p354_p0)
}
 0x126   :  { %s358_s6 = scalar_lea.hbm %s486_s4, 128 }
 0x127   :  { %p359_p1 = scmp.ne.s32.totalorder %s486_s4, %s358_s6  ;;  %p362_p2 = scmp.lt.u32.totalorder %s358_s6, %s486_s4 }
 0x129   :  { %p364_p3 = pnand %p362_p2, %p359_p1 }
 0x12b   :  { %367 = shalt.err (!%p364_p3)
}
 0x12c   :  { %230 = dma.vmem_to_hbm [thread:$0]  %s225_s26, 128, %s486_s4, [#allocation5], %s376_s27, %s376_s27, %s377_s28  }
 0x12d   :  { %372 = dma.done.wait [#allocation5], 128  }
 0x12e   :  { %373 = vsyncadd [#allocation5], 4294967168 }
 0x12f   :  { %234 = vsyncpa [#allocation4], 1 }
 0x130   :  { %235 = vsyncpa [#allocation7], 1 }
 0x131   :  { %236 = vsyncpa [#allocation5], 1 }

</bundles_post_ra>
